<compile_context>
chip_gen: v7x
topology: tpu7x:2x2x1
jax: 0.10.0
libtpu: 0.0.40
codegen_flags: <defaults>
</compile_context>

<pallas_src>
import jax
import jax.numpy as jnp
from jax.experimental import pallas as pl
from jax.experimental.pallas import tpu as pltpu

IN_DIM = 784
HIDDEN = 256
OUT_DIM = 10

LANE = 128
TILE_B_MAX = 1024   # f32 x-tile ~3.2 MiB; total double-buffered footprint ~12 MiB


def mlp_kernel(x_ref, w1_ref, b1_ref, w2_ref, b2_ref, o_ref):
    # hidden = relu(x @ W1 + b1): bf16 MXU matmul with f32 accumulation,
    # f32 bias + ReLU on the VPU.
    x_bf16 = x_ref[...].astype(jnp.bfloat16)
    h = jnp.dot(x_bf16, w1_ref[...], preferred_element_type=jnp.float32)
    h = jnp.maximum(h + b1_ref[...], 0.0)               # b1 (1,256) broadcasts over rows
    # out = hidden @ W2 + b2: lane-dense 128-wide second matmul / unmasked store.
    out = jnp.dot(h.astype(jnp.bfloat16), w2_ref[...], preferred_element_type=jnp.float32)
    o_ref[...] = (out + b2_ref[...]).astype(o_ref.dtype)


def _round_up(x, m):
    return ((x + m - 1) // m) * m


def mlp_forward(x, w1, b1, w2, b2):
    """x: (B, 784) f32.  w1:(784,256) b1:(1,256) w2:(256,10) b2:(1,10).  Returns (B, 10) f32."""
    B, K = x.shape
    H = w1.shape[1]
    out_dim = w2.shape[1]
    N_pad = _round_up(max(out_dim, LANE), LANE)          # 10 -> 128 (lane-dense output)

    # Batch tiling: no padding of x.  Pick tile_b so the last grid step is nearly
    # full; Pallas masks the partial edge block on the output store (safe here:
    # there is no cross-row reduction inside a tile).
    num_tiles = -(-B // TILE_B_MAX)
    tile_b = min(_round_up(-(-B // num_tiles), 16), TILE_B_MAX)
    grid = (pl.cdiv(B, tile_b),)

    # One-time weight prep (tiny): bf16 weights for the MXU, lane-padded W2/b2.
    w1_bf = w1.astype(jnp.bfloat16)
    b1_f32 = b1.reshape(1, H).astype(jnp.float32)
    w2_bf = jnp.zeros((H, N_pad), jnp.bfloat16).at[:, :out_dim].set(w2.astype(jnp.bfloat16))
    b2_f32 = jnp.zeros((1, N_pad), jnp.float32).at[:, :out_dim].set(
        b2.reshape(1, out_dim).astype(jnp.float32))

    # Weights/biases: constant index map (VMEM-resident) + single buffer.
    def resident(shape):
        return pl.BlockSpec(shape, lambda i: (0, 0), pipeline_mode=pl.Buffered(1))

    flops = 2 * B * K * H + 2 * B * H * N_pad
    bytes_accessed = (4 * B * K                      # x tiles (f32)
                      + 2 * K * H + 4 * H            # W1 (bf16) + b1 (f32)
                      + 2 * H * N_pad + 4 * N_pad    # W2 (bf16) + b2 (f32)
                      + 4 * B * N_pad)               # lane-padded output (f32)

    out_padded = pl.pallas_call(
        mlp_kernel,
        out_shape=jax.ShapeDtypeStruct((B, N_pad), jnp.float32),
        grid=grid,
        in_specs=[
            pl.BlockSpec((tile_b, K), lambda i: (i, 0)),   # x tile, pipelined over batch
            resident((K, H)),                              # W1 (bf16), resident, 1 buffer
            resident((1, H)),                              # b1 (f32)
            resident((H, N_pad)),                          # W2 (bf16, padded to 128 cols)
            resident((1, N_pad)),                          # b2 (f32, padded)
        ],
        out_specs=pl.BlockSpec((tile_b, N_pad), lambda i: (i, 0)),
        compiler_params=pltpu.CompilerParams(
            dimension_semantics=("parallel",),             # split batch grid across TCs (v7x)
            vmem_limit_bytes=32 * 1024 * 1024,             # covers v5e's 16 MiB scoped default
        ),
        cost_estimate=pl.CostEstimate(
            flops=flops, transcendentals=0, bytes_accessed=bytes_accessed),
    )(x, w1_bf, b1_f32, w2_bf, b2_f32)

    # Drop the 118 padded output lanes; under jit this slice fuses with the consumer.
    return out_padded[:, :out_dim]


def init_params(key, in_dim=IN_DIM, hidden_dim=HIDDEN, out_dim=OUT_DIM, dtype=jnp.float32):
    """Deterministic init mimicking nn.Linear's U(-1/sqrt(fan_in), 1/sqrt(fan_in))."""
    k1, k2, k3, k4 = jax.random.split(key, 4)
    bound1 = 1.0 / (in_dim ** 0.5)
    bound2 = 1.0 / (hidden_dim ** 0.5)
    w1 = jax.random.uniform(k1, (in_dim, hidden_dim), dtype, -bound1, bound1)
    b1 = jax.random.uniform(k2, (1, hidden_dim), dtype, -bound1, bound1)
    w2 = jax.random.uniform(k3, (hidden_dim, out_dim), dtype, -bound2, bound2)
    b2 = jax.random.uniform(k4, (1, out_dim), dtype, -bound2, bound2)
    return w1, b1, w2, b2


if __name__ == "__main__":
    key = jax.random.PRNGKey(0)
    kx, kp = jax.random.split(key)

    B = 2
    x = jax.random.normal(kx, (B, IN_DIM), jnp.float32)
    w1, b1, w2, b2 = init_params(kp)

    out = jax.jit(mlp_forward)(x, w1, b1, w2, b2)
    out = jax.block_until_ready(out)

    # Pure-JAX f32 reference of the same math.  Tolerance loosened because the
    # kernel uses bf16 MXU operands (f32 accumulation).
    ref = jnp.maximum(x @ w1 + b1, 0.0) @ w2 + b2
    assert out.shape == (B, OUT_DIM)
    assert jnp.allclose(out, ref, atol=1e-2, rtol=1e-2)

    print("KERNEL_OK")
</pallas_src>

<mosaic_0001>
module attributes {stable_mosaic.version = 11 : i64} {
  func.func @mlp_kernel(%arg0: i32, %arg1: memref<16x784xf32, #tpu.memory_space<vmem>>, %arg2: memref<784x256xbf16, #tpu.memory_space<vmem>>, %arg3: memref<1x256xf32, #tpu.memory_space<vmem>>, %arg4: memref<256x128xbf16, #tpu.memory_space<vmem>>, %arg5: memref<1x128xf32, #tpu.memory_space<vmem>>, %arg6: memref<16x128xf32, #tpu.memory_space<vmem>>) attributes {dimension_semantics = [#tpu.dimension_semantics<parallel>], iteration_bounds = array<i64: 1>, scalar_prefetch = 0 : i64, scratch_operands = 0 : i64, tpu.core_type = #tpu.core_type<tc>, window_params = [{transform_indices = @transform_0, window_bounds = array<i64: 16, 784>}, {pipeline_mode = #tpu.pipeline_mode<synchronous>, transform_indices = @transform_1, window_bounds = array<i64: 784, 256>}, {pipeline_mode = #tpu.pipeline_mode<synchronous>, transform_indices = @transform_2, window_bounds = array<i64: 1, 256>}, {pipeline_mode = #tpu.pipeline_mode<synchronous>, transform_indices = @transform_3, window_bounds = array<i64: 256, 128>}, {pipeline_mode = #tpu.pipeline_mode<synchronous>, transform_indices = @transform_4, window_bounds = array<i64: 1, 128>}, {transform_indices = @transform_5, window_bounds = array<i64: 16, 128>}]} {
    %c0 = arith.constant 0 : index
    %c0_0 = arith.constant 0 : index
    %0 = vector.load %arg1[%c0, %c0_0] : memref<16x784xf32, #tpu.memory_space<vmem>>, vector<16x784xf32>
    %1 = arith.truncf %0 : vector<16x784xf32> to vector<16x784xbf16>
    %c0_1 = arith.constant 0 : index
    %c0_2 = arith.constant 0 : index
    %2 = vector.load %arg2[%c0_1, %c0_2] : memref<784x256xbf16, #tpu.memory_space<vmem>>, vector<784x256xbf16>
    %cst = arith.constant dense<0.000000e+00> : vector<16x256xf32>
    %3 = tpu.matmul %1, %2, %cst {dimension_numbers = #tpu.dot_dimension_numbers<[1], [0], [0], [1], [0, 0, 1, 1], [], []>} : vector<16x784xbf16>, vector<784x256xbf16>, vector<16x256xf32> -> vector<16x256xf32>
    %c0_3 = arith.constant 0 : index
    %c0_4 = arith.constant 0 : index
    %4 = vector.load %arg3[%c0_3, %c0_4] : memref<1x256xf32, #tpu.memory_space<vmem>>, vector<1x256xf32>
    %5 = vector.broadcast %4 : vector<1x256xf32> to vector<16x256xf32>
    %6 = arith.addf %3, %5 : vector<16x256xf32>
    %cst_5 = arith.constant 0.000000e+00 : f32
    %7 = vector.broadcast %cst_5 : f32 to vector<16x256xf32>
    %8 = arith.maximumf %6, %7 : vector<16x256xf32>
    %9 = arith.truncf %8 : vector<16x256xf32> to vector<16x256xbf16>
    %c0_6 = arith.constant 0 : index
    %c0_7 = arith.constant 0 : index
    %10 = vector.load %arg4[%c0_6, %c0_7] : memref<256x128xbf16, #tpu.memory_space<vmem>>, vector<256x128xbf16>
    %cst_8 = arith.constant dense<0.000000e+00> : vector<16x128xf32>
    %11 = tpu.matmul %9, %10, %cst_8 {dimension_numbers = #tpu.dot_dimension_numbers<[1], [0], [0], [1], [0, 0, 1, 1], [], []>} : vector<16x256xbf16>, vector<256x128xbf16>, vector<16x128xf32> -> vector<16x128xf32>
    %c0_9 = arith.constant 0 : index
    %c0_10 = arith.constant 0 : index
    %12 = vector.load %arg5[%c0_9, %c0_10] : memref<1x128xf32, #tpu.memory_space<vmem>>, vector<1x128xf32>
    %13 = vector.broadcast %12 : vector<1x128xf32> to vector<16x128xf32>
    %14 = arith.addf %11, %13 : vector<16x128xf32>
    %c0_11 = arith.constant 0 : index
    %c0_12 = arith.constant 0 : index
    %15 = vector.load %arg6[%c0_11, %c0_12] : memref<16x128xf32, #tpu.memory_space<vmem>>, vector<16x128xf32>
    tpu.vector_store %arg6[%c0_11, %c0_12], %14 {strides = array<i32>} : memref<16x128xf32, #tpu.memory_space<vmem>>, vector<16x128xf32>,
    return
  }
  func.func @transform_0(%arg0: i32) -> (i32, i32) {
    %c0_i32 = arith.constant 0 : i32
    %c0_i32_0 = arith.constant 0 : i32
    return %arg0, %c0_i32 : i32, i32
  }
  func.func @transform_1(%arg0: i32) -> (i32, i32) {
    %c0_i32 = arith.constant 0 : i32
    %c0_i32_0 = arith.constant 0 : i32
    %c0_i32_1 = arith.constant 0 : i32
    return %c0_i32, %c0_i32_0 : i32, i32
  }
  func.func @transform_2(%arg0: i32) -> (i32, i32) {
    %c0_i32 = arith.constant 0 : i32
    %c0_i32_0 = arith.constant 0 : i32
    %c0_i32_1 = arith.constant 0 : i32
    return %c0_i32, %c0_i32_0 : i32, i32
  }
  func.func @transform_3(%arg0: i32) -> (i32, i32) {
    %c0_i32 = arith.constant 0 : i32
    %c0_i32_0 = arith.constant 0 : i32
    %c0_i32_1 = arith.constant 0 : i32
    return %c0_i32, %c0_i32_0 : i32, i32
  }
  func.func @transform_4(%arg0: i32) -> (i32, i32) {
    %c0_i32 = arith.constant 0 : i32
    %c0_i32_0 = arith.constant 0 : i32
    %c0_i32_1 = arith.constant 0 : i32
    return %c0_i32, %c0_i32_0 : i32, i32
  }
  func.func @transform_5(%arg0: i32) -> (i32, i32) {
    %c0_i32 = arith.constant 0 : i32
    %c0_i32_0 = arith.constant 0 : i32
    return %arg0, %c0_i32 : i32, i32
  }
}

</mosaic_0001>

<bundles_post_ra>
// kernel: mlp_forward.1
= control target key start
LH: loop header
LB: loop body
LE: loop exit
PB: predicated region body
PF: predicated region fallthrough
CT: control target
= control target key end

     0   :  { %s2061_s0 = inlined_call_operand.vmem [shape: f32[2,784], index: 0, kind: input, shape index: {}]   ;;  %s2062_s1 = inlined_call_operand.vmem [shape: bf16[784,256], index: 1, kind: input, shape index: {}]   ;;  %s2063_s2 = inlined_call_operand.vmem [shape: f32[1,256], index: 2, kind: input, shape index: {}]   ;;  %s2064_s3 = inlined_call_operand.vmem [shape: bf16[256,128], index: 3, kind: input, shape index: {}]   ;;  %s2065_s4 = inlined_call_operand.vmem [shape: f32[1,128], index: 4, kind: input, shape index: {}]   ;;  %s2066_s5 = inlined_call_operand.hbm [shape: f32[2,128], index: 5, kind: output, shape index: {}]  }
   0x1   :  { %v1352_v0 = vld [vmem:[%s2062_s1 + $0x104] ss:$8 sps:$4 sm:$0xff]   ;;  %v1354_v1 = vld [vmem:[%s2062_s1 + $0x100] ss:$8 sps:$4 sm:$0xff]   ;;  %v1355_v2 = vld [vmem:[%s2062_s1 + $0x114] ss:$8 sps:$4 sm:$0xff]  }
   0x2   :  { %864 = vmatprep.subr.bf16.mxu0 %v1352_v0  ;;  %v1357_v3 = vld [vmem:[%s2062_s1 + $0x110] ss:$8 sps:$4 sm:$0xff]   ;;  %v1358_v4 = vld [vmem:[%s2062_s1 + $0x124] ss:$8 sps:$4 sm:$0xff]   ;;  %v1360_v5 = vld [vmem:[%s2062_s1 + $0x120] ss:$8 sps:$4 sm:$0xff]  }
   0x3   :  { %865 = vmatpush1.bf16.msra.mxu0 %v1354_v1  ;;  %v1361_v6 = vld [vmem:[%s2062_s1 + $0x134] ss:$8 sps:$4 sm:$0xff]   ;;  %v1363_v7 = vld [vmem:[%s2062_s1 + $0x130] ss:$8 sps:$4 sm:$0xff]   ;;  %v1364_v8 = vld [vmem:[%s2062_s1 + $0x144] ss:$8 sps:$4 sm:$0xff]  }
   0x4   :  { %866 = vmatprep.subr.bf16.mxu0 %v1355_v2  ;;  %v1366_v9 = vld [vmem:[%s2062_s1 + $0x140] ss:$8 sps:$4 sm:$0xff]   ;;  %v1367_v10 = vld [vmem:[%s2062_s1 + $0x154] ss:$8 sps:$4 sm:$0xff]   ;;  %v1369_v11 = vld [vmem:[%s2062_s1 + $0x150] ss:$8 sps:$4 sm:$0xff]  }
   0x5   :  { %v1370_v12 = vld [vmem:[%s2062_s1 + $0x164] ss:$8 sps:$4 sm:$0xff]  }
   0x7   :  { %867 = vmatpush1.bf16.msra.mxu0 %v1357_v3 }
   0x8   :  { %868 = vmatprep.subr.bf16.mxu0 %v1358_v4 }
   0xb   :  { %869 = vmatpush1.bf16.msra.mxu0 %v1360_v5 }
   0xc   :  { %870 = vmatprep.subr.bf16.mxu0 %v1361_v6 }
   0xf   :  { %871 = vmatpush1.bf16.msra.mxu0 %v1363_v7 }
  0x10   :  { %872 = vmatprep.subr.bf16.mxu0 %v1364_v8 }
  0x11   :  { %10 = vsyncpa [#allocation3], 0  ;;  %v1563_v13 = vmov 1983009808   ;;  %v61_v15 = vlaneseq  ;;  %v1394_v16 = vld [vmem:[%s2062_s1 + $0x4] ss:$8 sps:$4 sm:$0xff]  }
  0x12   :  { %v59_v14 = vunpack.c.l.s4 %v1563_v13  ;;  %v1396_v17 = vld [vmem:[%s2062_s1] ss:$8 sps:$4 sm:$0xff]   ;;  %821 = vmatprep.subr.bf16.mxu1 %v1394_v16  ;;  %v1400_v18 = vld [vmem:[%s2062_s1 + $0x14] ss:$8 sps:$4 sm:$0xff]   ;;  %v1402_v19 = vld [vmem:[%s2062_s1 + $0x10] ss:$8 sps:$4 sm:$0xff]  }
  0x13   :  { %873 = vmatpush1.bf16.msra.mxu0 %v1366_v9  ;;  %822 = vmatpush1.bf16.msra.mxu1 %v1396_v17  ;;  %v1649_v21 = vshrl.u32 %v61_v15, 7  ;;  %v1372_v22 = vld [vmem:[%s2062_s1 + $0x160] ss:$8 sps:$4 sm:$0xff]   ;;  %v1373_v23 = vld [vmem:[%s2062_s1 + $0x174] ss:$8 sps:$4 sm:$0xff]   ;;  %vm817_vm0 = vcmask 130048  }
  0x14   :  { %874 = vmatprep.subr.bf16.mxu0 %v1367_v10  ;;  %v60_v20 = vunpack.c.0.s8 %v59_v14  ;;  %823 = vmatprep.subr.bf16.mxu1 %v1400_v18  ;;  %v1375_v24 = vld [vmem:[%s2062_s1 + $0x170] ss:$8 sps:$4 sm:$0xff]   ;;  %v1406_v25 = vld [vmem:[%s2062_s1 + $0x24] ss:$8 sps:$4 sm:$0xff]   ;;  %v1408_v26 = vld [vmem:[%s2062_s1 + $0x20] ss:$8 sps:$4 sm:$0xff]  }
  0x15   :  { %v1376_v27 = vld [vmem:[%s2062_s1 + $0x184] ss:$8 sps:$4 sm:$0xff]   ;;  %v1378_v33 = vld [vmem:[%s2062_s1 + $0x180] ss:$8 sps:$4 sm:$0xff]   ;;  %v1379_v34 = vld [vmem:[%s2062_s1 + $0x194] ss:$8 sps:$4 sm:$0xff]  }
  0x16   :  { %v1670_v28 = vsub.s32 %v60_v20, %v1649_v21  ;;  %v1409_v29 = vld [vmem:[%s2061_s0 + $0x4] ss:$14 sps:$4 sm:$0xff]   ;;  %v1411_v30 = vld [vmem:[%s2061_s0 + $0x20] ss:$14 sps:$4 sm:$0xff]   ;;  %v1413_v31 = vld [vmem:[%s2061_s0 + $0x3c] ss:$14 sps:$4 sm:$0xff]  }
  0x17   :  { %875 = vmatpush1.bf16.msra.mxu0 %v1369_v11  ;;  %824 = vmatpush1.bf16.msra.mxu1 %v1402_v19  ;;  %v1415_v32 = vld [vmem:[%s2061_s0 + $0x58] ss:$14 sps:$4 sm:$0xff]   ;;  %v1420_v39 = vld [vmem:[%s2062_s1 + $0x34] ss:$8 sps:$4 sm:$0xff]   ;;  %v1498_v18 = vld [vmem:[%s2061_s0] ss:$14 sps:$4 sm:$0xff]  }
  0x18   :  { %876 = vmatprep.subr.bf16.mxu0 %v1370_v12  ;;  %825 = vmatprep.subr.bf16.mxu1 %v1406_v25  ;;  %v1691_v35 = vrot.slane %v1409_v29, %v1670_v28  ;;  %v1694_v36 = vrot.slane %v1411_v30, %v1670_v28  ;;  %v1697_v37 = vrot.slane %v1413_v31, %v1670_v28  ;;  %v1422_v41 = vld [vmem:[%s2062_s1 + $0x30] ss:$8 sps:$4 sm:$0xff]   ;;  %v1426_v43 = vld [vmem:[%s2062_s1 + $0x44] ss:$8 sps:$4 sm:$0xff]   ;;  %v1428_v44 = vld [vmem:[%s2062_s1 + $0x40] ss:$8 sps:$4 sm:$0xff]  }
  0x19   :  { %v1700_v38 = vrot.slane %v1415_v32, %v1670_v28  ;;  %v1381_v45 = vld [vmem:[%s2062_s1 + $0x190] ss:$8 sps:$4 sm:$0xff]   ;;  %v1382_v47 = vld [vmem:[%s2062_s1 + $0x1a4] ss:$8 sps:$4 sm:$0xff]   ;;  %v1432_v48 = vld [vmem:[%s2062_s1 + $0x54] ss:$8 sps:$4 sm:$0xff]  }
  0x1a   :  { %v89_v40 = vcombine.high %v1691_v35, %v1694_v36  ;;  %v1384_v49 = vld [vmem:[%s2062_s1 + $0x1a0] ss:$8 sps:$4 sm:$0xff]   ;;  %v1434_v50 = vld [vmem:[%s2062_s1 + $0x50] ss:$8 sps:$4 sm:$0xff]   ;;  %v1438_v51 = vld [vmem:[%s2062_s1 + $0x64] ss:$8 sps:$4 sm:$0xff]   ;;  %v88_v6 = vcombine.low %v1691_v35, %v1694_v36 }
  0x1b   :  { %877 = vmatpush1.bf16.msra.mxu0 %v1372_v22  ;;  %826 = vmatpush1.bf16.msra.mxu1 %v1408_v26  ;;  %v160_v42 = vcombine.high %v1697_v37, %v1700_v38  ;;  %v1385_v52 = vld [vmem:[%s2062_s1 + $0x1b4] ss:$8 sps:$4 sm:$0xff]   ;;  %v1387_v53 = vld [vmem:[%s2062_s1 + $0x1b0] ss:$8 sps:$4 sm:$0xff]   ;;  %v1440_v54 = vld [vmem:[%s2062_s1 + $0x60] ss:$8 sps:$4 sm:$0xff]   ;;  %v159_v7 = vcombine.low %v1697_v37, %v1700_v38 }
  0x1c   :  { %878 = vmatprep.subr.bf16.mxu0 %v1373_v23  ;;  %827 = vmatprep.subr.bf16.mxu1 %v1420_v39  ;;  %v1444_v55 = vld [vmem:[%s2062_s1 + $0x74] ss:$8 sps:$4 sm:$0xff]   ;;  %v1388_v56 = vld [vmem:[%s2062_s1 + $0x1c4] ss:$8 sps:$4 sm:$0xff]   ;;  %v1390_v57 = vld [vmem:[%s2062_s1 + $0x1c0] ss:$8 sps:$4 sm:$0xff]  }
  0x1d   :  { %v213_v46 = vpack.c.bf16 %v160_v42, %v89_v40  ;;  %v1446_v58 = vld [vmem:[%s2062_s1 + $0x70] ss:$8 sps:$4 sm:$0xff]   ;;  %v1450_v59 = vld [vmem:[%s2062_s1 + $0x84] ss:$8 sps:$4 sm:$0xff]   ;;  %v1391_v60 = vld [vmem:[%s2062_s1 + $0x1d4] ss:$8 sps:$4 sm:$0xff]   ;;  %v212_v12 = vpack.c.bf16 %v159_v7, %v88_v6 }
  0x1e   :  { %v1393_v61 = vld [vmem:[%s2062_s1 + $0x1d0] ss:$8 sps:$4 sm:$0xff]   ;;  %v1452_v62 = vld [vmem:[%s2062_s1 + $0x80] ss:$8 sps:$4 sm:$0xff]   ;;  %v1456_v63 = vld [vmem:[%s2062_s1 + $0x94] ss:$8 sps:$4 sm:$0xff]  }
  0x1f   :  { %879 = vmatpush1.bf16.msra.mxu0 %v1375_v24  ;;  %828 = vmatpush1.bf16.msra.mxu1 %v1422_v41  ;;  %v1397_v0 = vld [vmem:[%s2062_s1 + $0x1e4] ss:$8 sps:$4 sm:$0xff]   ;;  %v1399_v1 = vld [vmem:[%s2062_s1 + $0x1e0] ss:$8 sps:$4 sm:$0xff]   ;;  %v1458_v2 = vld [vmem:[%s2062_s1 + $0x90] ss:$8 sps:$4 sm:$0xff]   ;;  %v64_v24 = vrot.slane %v1498_v18, %v1670_v28 }
  0x20   :  { %880 = vmatprep.subr.bf16.mxu0 %v1376_v27  ;;  %829 = vmatprep.subr.bf16.mxu1 %v1426_v43  ;;  %v1462_v3 = vld [vmem:[%s2062_s1 + $0xa4] ss:$8 sps:$4 sm:$0xff]   ;;  %v1403_v4 = vld [vmem:[%s2062_s1 + $0x1f4] ss:$8 sps:$4 sm:$0xff]   ;;  %v1405_v5 = vld [vmem:[%s2062_s1 + $0x1f0] ss:$8 sps:$4 sm:$0xff]  }
  0x21   :  { %896 = vmatprep.mubr.bf16.mxu0 %v213_v46  ;;  %v1464_v8 = vld [vmem:[%s2062_s1 + $0xa0] ss:$8 sps:$4 sm:$0xff]   ;;  %v1468_v9 = vld [vmem:[%s2062_s1 + $0xb4] ss:$8 sps:$4 sm:$0xff]   ;;  %v1419_v10 = vld [vmem:[%s2062_s1 + $0x204] ss:$8 sps:$4 sm:$0xff]  }
  0x22   :  { %v1417_v11 = vld [vmem:[%s2062_s1 + $0x200] ss:$8 sps:$4 sm:$0xff]   ;;  %v1470_v13 = vld [vmem:[%s2062_s1 + $0xb0] ss:$8 sps:$4 sm:$0xff]   ;;  %v1474_v14 = vld [vmem:[%s2062_s1 + $0xc4] ss:$8 sps:$4 sm:$0xff]  }
  0x23   :  { %881 = vmatpush1.bf16.msra.mxu0 %v1378_v33  ;;  %830 = vmatpush1.bf16.msra.mxu1 %v1428_v44  ;;  %v1425_v15 = vld [vmem:[%s2062_s1 + $0x214] ss:$8 sps:$4 sm:$0xff]   ;;  %v1423_v16 = vld [vmem:[%s2062_s1 + $0x210] ss:$8 sps:$4 sm:$0xff]   ;;  %v1476_v17 = vld [vmem:[%s2062_s1 + $0xc0] ss:$8 sps:$4 sm:$0xff]  }
  0x24   :  { %882 = vmatprep.subr.bf16.mxu0 %v1379_v34  ;;  %831 = vmatprep.subr.bf16.mxu1 %v1432_v48  ;;  %v1499_v19 = vld [vmem:[%s2061_s0 + $0x1c] ss:$14 sps:$4 sm:$0xff]   ;;  %v1500_v20 = vld [vmem:[%s2061_s0 + $0x38] ss:$14 sps:$4 sm:$0xff]   ;;  %v1501_v22 = vld [vmem:[%s2061_s0 + $0x54] ss:$14 sps:$4 sm:$0xff]  }
  0x25   :  { %v1480_v23 = vld [vmem:[%s2062_s1 + $0xd4] ss:$8 sps:$4 sm:$0xff]   ;;  %v1431_v25 = vld [vmem:[%s2062_s1 + $0x224] ss:$8 sps:$4 sm:$0xff]   ;;  %v78_v26 = vrot.slane %v1499_v19, %v1670_v28  ;;  %v135_v27 = vrot.slane %v1500_v20, %v1670_v28  ;;  %v149_v29 = vrot.slane %v1501_v22, %v1670_v28  ;;  %v1429_v30 = vld [vmem:[%s2062_s1 + $0x220] ss:$8 sps:$4 sm:$0xff]  }
  0x26   :  { %v1437_v31 = vld [vmem:[%s2062_s1 + $0x234] ss:$8 sps:$4 sm:$0xff]   ;;  %v1482_v32 = vld [vmem:[%s2062_s1 + $0xd0] ss:$8 sps:$4 sm:$0xff]   ;;  %v1486_v33 = vld [vmem:[%s2062_s1 + $0xe4] ss:$8 sps:$4 sm:$0xff]  }
  0x27   :  { %883 = vmatpush1.bf16.msra.mxu0 %v1381_v45  ;;  %832 = vmatpush1.bf16.msra.mxu1 %v1434_v50  ;;  %v87_v34 = vcombine.high %v64_v24, %v78_v26  ;;  %v158_v35 = vcombine.high %v135_v27, %v149_v29  ;;  %v1435_v37 = vld [vmem:[%s2062_s1 + $0x230] ss:$8 sps:$4 sm:$0xff]   ;;  %v1443_v39 = vld [vmem:[%s2062_s1 + $0x244] ss:$8 sps:$4 sm:$0xff]   ;;  %v1488_v40 = vld [vmem:[%s2062_s1 + $0xe0] ss:$8 sps:$4 sm:$0xff]   ;;  %v86_v48 = vcombine.low %v64_v24, %v78_v26 }
  0x28   :  { %884 = vmatprep.subr.bf16.mxu0 %v1382_v47  ;;  %833 = vmatprep.subr.bf16.mxu1 %v1438_v51  ;;  %v1511_v38 = vld [vmem:[%s2061_s0 + $0x8] ss:$14 sps:$4 sm:$0xff]   ;;  %v1514_v42 = vld [vmem:[%s2061_s0 + $0x24] ss:$14 sps:$4 sm:$0xff]   ;;  %v1517_v46 = vld [vmem:[%s2061_s0 + $0x40] ss:$14 sps:$4 sm:$0xff]  }
  0x29   :  { %v211_v36 = vpack.c.bf16 %v158_v35, %v87_v34  ;;  %v1492_v41 = vld [vmem:[%s2062_s1 + $0xf4] ss:$8 sps:$4 sm:$0xff]   ;;  %v1513_v43 = vld [vmem:[%s2061_s0 + $0xc] ss:$14 sps:$4 sm:$0x33]   ;;  %v1880_v45 = vrot.slane %v1511_v38, %v1670_v28  ;;  %v1889_v50 = vrot.slane %v1514_v42, %v1670_v28  ;;  %v1523_v6 = vld [vmem:[%s2064_s3 + $0x40] sm:$0xff]  }
  0x2a   :  { %v1516_v44 = vld [vmem:[%s2061_s0 + $0x28] ss:$14 sps:$4 sm:$0x33]   ;;  %v1494_v47 = vld [vmem:[%s2062_s1 + $0xf0] ss:$8 sps:$4 sm:$0xff]   ;;  %v1532_v42 = vld [vmem:[%s2064_s3 + $0x20] sm:$0xff]  }
  0x2b   :  { %885 = vmatpush1.bf16.msra.mxu0 %v1384_v49  ;;  %834 = vmatpush1.bf16.msra.mxu1 %v1440_v54  ;;  %v157_v49 = vcombine.low %v135_v27, %v149_v29  ;;  %v1519_v51 = vld [vmem:[%s2061_s0 + $0x44] ss:$14 sps:$4 sm:$0x33]   ;;  %v1473_v19 = vld [vmem:[%s2062_s1 + $0x294] ss:$8 sps:$4 sm:$0xff]   ;;  %v122_v35 = vcombine.low %v1880_v45, %v1889_v50 }
  0x2c   :  { %886 = vmatprep.subr.bf16.mxu0 %v1385_v52  ;;  %835 = vmatprep.subr.bf16.mxu1 %v1444_v55  ;;  %v1520_v52 = vld [vmem:[%s2061_s0 + $0x5c] ss:$14 sps:$4 sm:$0xff]   ;;  %v1522_v55 = vld [vmem:[%s2061_s0 + $0x60] ss:$14 sps:$4 sm:$0x33]   ;;  %v1527_v18 = vld [vmem:[%s2064_s3 + $0x50] sm:$0xff]  }
  0x2d   :  { %853 = vmatprep.mubr.bf16.mxu1 %v211_v36  ;;  %v1507_v54 = vld [vmem:[%s2062_s1 + $0x304] ss:$8 sps:$4 sm:$0xff]   ;;  %v1528_v20 = vld [vmem:[%s2064_s3 + $0x10] sm:$0xff]   ;;  %v1477_v24 = vld [vmem:[%s2062_s1 + $0x2a0] ss:$8 sps:$4 sm:$0xff]  }
  0x2e   :  { %v1471_v22 = vld [vmem:[%s2062_s1 + $0x290] ss:$8 sps:$4 sm:$0xff]   ;;  %v1491_v27 = vld [vmem:[%s2062_s1 + $0x2c4] ss:$8 sps:$4 sm:$0xff]   ;;  %v1489_v29 = vld [vmem:[%s2062_s1 + $0x2c0] ss:$8 sps:$4 sm:$0xff]  }
  0x2f   :  { %887 = vmatpush1.bf16.msra.mxu0 %v1387_v53  ;;  %836 = vmatpush1.bf16.msra.mxu1 %v1446_v58  ;;  %v1441_v53 = vld [vmem:[%s2062_s1 + $0x240] ss:$8 sps:$4 sm:$0xff]   ;;  %v123_v58 = vcombine.high %v1880_v45, %v1889_v50  ;;  %v1483_v26 = vld [vmem:[%s2062_s1 + $0x2b0] ss:$8 sps:$4 sm:$0xff]   ;;  %v1510_v34 = vld [vmem:[%s2062_s1 + $0x2f4] ss:$8 sps:$4 sm:$0xff]  }
  0x30   :  { %888 = vmatprep.subr.bf16.mxu0 %v1388_v56  ;;  %837 = vmatprep.subr.bf16.mxu1 %v1450_v59  ;;  %v1907_v56 = vrot.slane %v1517_v46, %v1670_v28  ;;  %v1915_v59 = vrot.slane %v1520_v52, %v1670_v28  ;;  %v1535_v45 = vld [vmem:[%s2064_s3 + $0x70] sm:$0xff]  }
  0x31   :  { %v1536_v46 = vld [vmem:[%s2064_s3 + $0x30] sm:$0xff]  }
  0x32   :  { %v193_v36 = vcombine.low %v1907_v56, %v1915_v59 }
  0x33   :  { %889 = vmatpush1.bf16.msra.mxu0 %v1390_v57  ;;  %838 = vmatpush1.bf16.msra.mxu1 %v1452_v62  ;;  %v1449_v57 = vld [vmem:[%s2062_s1 + $0x254] ss:$8 sps:$4 sm:$0xff]   ;;  %v1447_v62 = vld [vmem:[%s2062_s1 + $0x250] ss:$8 sps:$4 sm:$0xff]  }
  0x34   :  { %890 = vmatprep.subr.bf16.mxu0 %v1391_v60  ;;  %839 = vmatprep.subr.bf16.mxu1 %v1456_v63  ;;  %v210_v60 = vpack.c.bf16 %v157_v49, %v86_v48  ;;  %v107_v63 = vrot.slane %v1513_v43, %v1670_v28  ;;  %v214_v38 = vpack.c.bf16 %v193_v36, %v122_v35  ;;  %v1533_v43 = vld [vmem:[%s2064_s3 + $0x68] sm:$0xff]   ;;  %v1538_v48 = vld [vmem:[%s2064_s3 + $0x38] sm:$0xff]  }
  0x37   :  { %891 = vmatpush1.bf16.msra.mxu0 %v1393_v61  ;;  %840 = vmatpush1.bf16.msra.mxu1 %v1458_v2  ;;  %v194_v61 = vcombine.high %v1907_v56, %v1915_v59  ;;  %v192_v2 = vrot.slane %v1522_v55, %v1670_v28  ;;  %v323_v59 = vsub.s32 1, %v1649_v21 }
  0x38   :  { %892 = vmatprep.subr.bf16.mxu0 %v1397_v0  ;;  %841 = vmatprep.subr.bf16.mxu1 %v1462_v3  ;;  %v121_v0 = vrot.slane %v1516_v44, %v1670_v28  ;;  %v1455_v3 = vld [vmem:[%s2062_s1 + $0x264] ss:$8 sps:$4 sm:$0xff]  }
  0x39   :  { %v1534_v44 = vld [vmem:[%s2064_s3 + $0x28] sm:$0xff]  }
  0x3a   :  { %v124_v7 = vcombine.low %v107_v63, %v121_v0 }
  0x3b   :  { %893 = vmatpush1.bf16.msra.mxu0 %v1399_v1  ;;  %842 = vmatpush1.bf16.msra.mxu1 %v1464_v8  ;;  %v178_v1 = vrot.slane %v1519_v51, %v1670_v28  ;;  %v1453_v28 = vld [vmem:[%s2062_s1 + $0x260] ss:$8 sps:$4 sm:$0xff]  }
  0x3c   :  { %894 = vmatprep.subr.bf16.mxu0 %v1403_v4  ;;  %843 = vmatprep.subr.bf16.mxu1 %v1468_v9  ;;  %v1505_v4 = vld [vmem:[%s2062_s1 + $0x300] ss:$8 sps:$4 sm:$0xff]   ;;  %v1461_v9 = vld [vmem:[%s2062_s1 + $0x274] ss:$8 sps:$4 sm:$0xff]  }
  0x3d   :  { %v195_v8 = vcombine.low %v178_v1, %v192_v2 }
  0x3f   :  { %895 = vmatpush1.bf16.msra.mxu0 %v1405_v5  ;;  %844 = vmatpush1.bf16.msra.mxu1 %v1470_v13  ;;  %v215_v5 = vpack.c.bf16 %v194_v61, %v123_v58  ;;  %v1459_v13 = vld [vmem:[%s2062_s1 + $0x270] ss:$8 sps:$4 sm:$0xff]   ;;  %v315_v58 = vld [vmem:[%s2063_s2] sm:$0x3] }
  0x40   :  { %907 = vmatprep.subr.bf16.mxu0 %v1419_v10  ;;  %845 = vmatprep.subr.bf16.mxu1 %v1474_v14  ;;  %v1564_v10 = vmov 0   ;;  %v1525_v14 = vld [vmem:[%s2064_s3 + $0x48] sm:$0xff]   ;;  %v324_v61 = vrot.slane %v315_v58, %v323_v59 }
  0x42   :  { %897 = vmatmul.mubr.bf16.vlgmr.msra.gmra.mrb[0].mxu0 %v212_v12  ;;  %v1524_v12 = vld [vmem:[%s2064_s3] sm:$0xff]  }
  0x43   :  { %908 = vmatpush1.bf16.msra.mxu0 %v1417_v11  ;;  %846 = vmatpush1.bf16.msra.mxu1 %v1476_v17  ;;  %v216_v11 = vpack.c.bf16 %v195_v8, %v124_v7  ;;  %v1465_v17 = vld [vmem:[%s2062_s1 + $0x280] ss:$8 sps:$4 sm:$0xff]  }
  0x44   :  { %909 = vmatprep.subr.bf16.mxu0 %v1425_v15  ;;  %847 = vmatprep.subr.bf16.mxu1 %v1480_v23  ;;  %v1467_v15 = vld [vmem:[%s2062_s1 + $0x284] ss:$8 sps:$4 sm:$0xff]  }
  0x45   :  { %939 = vmatprep.mubr.bf16.mxu0 %v215_v5  ;;  %v1479_v23 = vld [vmem:[%s2062_s1 + $0x2a4] ss:$8 sps:$4 sm:$0xff]  }
  0x47   :  { %910 = vmatpush1.bf16.msra.mxu0 %v1423_v16  ;;  %848 = vmatpush1.bf16.msra.mxu1 %v1482_v32  ;;  %v1526_v16 = vld [vmem:[%s2064_s3 + $0x8] sm:$0xff]  }
  0x48   :  { %911 = vmatprep.subr.bf16.mxu0 %v1431_v25  ;;  %849 = vmatprep.subr.bf16.mxu1 %v1486_v33  ;;  %v1485_v25 = vld [vmem:[%s2062_s1 + $0x2b4] ss:$8 sps:$4 sm:$0xff]   ;;  %v1504_v32 = vld [vmem:[%s2062_s1 + $0x2e4] ss:$8 sps:$4 sm:$0xff]   ;;  %v1502_v33 = vld [vmem:[%s2062_s1 + $0x2e0] ss:$8 sps:$4 sm:$0xff]  }
  0x4b   :  { %912 = vmatpush1.bf16.msra.mxu0 %v1429_v30  ;;  %850 = vmatpush1.bf16.msra.mxu1 %v1488_v40  ;;  %v1497_v30 = vld [vmem:[%s2062_s1 + $0x2d4] ss:$8 sps:$4 sm:$0xff]  }
  0x4c   :  { %913 = vmatprep.subr.bf16.mxu0 %v1437_v31  ;;  %851 = vmatprep.subr.bf16.mxu1 %v1492_v41  ;;  %v1495_v31 = vld [vmem:[%s2062_s1 + $0x2d0] ss:$8 sps:$4 sm:$0xff]   ;;  %v1531_v41 = vld [vmem:[%s2064_s3 + $0x60] sm:$0xff]  }
  0x4d   :  { %v1530_v40 = vld [vmem:[%s2064_s3 + $0x18] sm:$0xff]  }
  0x4f   :  { %914 = vmatpush1.bf16.msra.mxu0 %v1435_v37  ;;  %852 = vmatpush1.bf16.msra.mxu1 %v1494_v47  ;;  %v1508_v37 = vld [vmem:[%s2062_s1 + $0x2f0] ss:$8 sps:$4 sm:$0xff]  }
  0x50   :  { %915 = vmatprep.subr.bf16.mxu0 %v1443_v39  ;;  %950 = vmatprep.subr.bf16.mxu1 %v1507_v54  ;;  %v1529_v39 = vld [vmem:[%s2064_s3 + $0x58] sm:$0xff]  }
  0x51   :  { %v1537_v47 = vld [vmem:[%s2064_s3 + $0x78] sm:$0xff]  }
  0x52   :  { %854 = vmatmul.mubr.bf16.vlgmr.msra.gmra.mrb[0].mxu1 %v210_v60 }
  0x53   :  { %916 = vmatpush1.bf16.msra.mxu0 %v1441_v53  ;;  %951 = vmatpush1.bf16.msra.mxu1 %v1505_v4 }
  0x54   :  { %917 = vmatprep.subr.bf16.mxu0 %v1449_v57  ;;  %982 = vmatprep.mubr.bf16.mxu1 %v1564_v10  ;;  %v319_v57 = vsub.s32 0, %v1649_v21 }
  0x55   :  { %1309 = vmatprep.subr.bf16.mxu1 %v1523_v6 }
  0x56   :  { %v320_v60 = vrot.slane %v315_v58, %v319_v57 }
  0x57   :  { %918 = vmatpush1.bf16.msra.mxu0 %v1447_v62 }
  0x58   :  { %919 = vmatprep.subr.bf16.mxu0 %v1455_v3 }
  0x5a   :  { %1291 = vmatmul.mubr.msk.bf16.vlgmr.msra.gmra.mrb[4].mxu1 %vm817_vm0, %v216_v11 }
  0x5b   :  { %920 = vmatpush1.bf16.msra.mxu0 %v1453_v28  ;;  %1310 = vmatpush3.bf16.msra.mxu1 %v1524_v12 }
  0x5c   :  { %921 = vmatprep.subr.bf16.mxu0 %v1461_v9  ;;  %1311 = vmatprep.subr.bf16.mxu1 %v1525_v14 }
  0x5f   :  { %922 = vmatpush1.bf16.msra.mxu0 %v1459_v13  ;;  %1312 = vmatpush3.bf16.msra.mxu1 %v1526_v16 }
  0x60   :  { %923 = vmatprep.subr.bf16.mxu0 %v1467_v15  ;;  %1313 = vmatprep.subr.bf16.mxu1 %v1527_v18 }
  0x63   :  { %924 = vmatpush1.bf16.msra.mxu0 %v1465_v17  ;;  %1314 = vmatpush3.bf16.msra.mxu1 %v1528_v20 }
  0x64   :  { %925 = vmatprep.subr.bf16.mxu0 %v1473_v19  ;;  %1315 = vmatprep.subr.bf16.mxu1 %v1529_v39  ;;  %v1292_v19 = vld [vmem:[%s2065_s4] ss:$0 sm:$0xff] }
  0x67   :  { %926 = vmatpush1.bf16.msra.mxu0 %v1471_v22  ;;  %1316 = vmatpush3.bf16.msra.mxu1 %v1530_v40 }
  0x68   :  { %927 = vmatprep.subr.bf16.mxu0 %v1479_v23  ;;  %1317 = vmatprep.subr.bf16.mxu1 %v1531_v41 }
  0x6b   :  { %928 = vmatpush1.bf16.msra.mxu0 %v1477_v24  ;;  %1318 = vmatpush3.bf16.msra.mxu1 %v1532_v42 }
  0x6c   :  { %929 = vmatprep.subr.bf16.mxu0 %v1485_v25  ;;  %1319 = vmatprep.subr.bf16.mxu1 %v1533_v43 }
  0x6f   :  { %930 = vmatpush1.bf16.msra.mxu0 %v1483_v26  ;;  %1320 = vmatpush3.bf16.msra.mxu1 %v1534_v44 }
  0x70   :  { %931 = vmatprep.subr.bf16.mxu0 %v1491_v27  ;;  %1321 = vmatprep.subr.bf16.mxu1 %v1535_v45 }
  0x73   :  { %932 = vmatpush1.bf16.msra.mxu0 %v1489_v29  ;;  %1322 = vmatpush3.bf16.msra.mxu1 %v1536_v46 }
  0x74   :  { %933 = vmatprep.subr.bf16.mxu0 %v1497_v30  ;;  %1323 = vmatprep.subr.bf16.mxu1 %v1537_v47 }
  0x77   :  { %934 = vmatpush1.bf16.msra.mxu0 %v1495_v31  ;;  %1324 = vmatpush3.bf16.msra.mxu1 %v1538_v48 }
  0x78   :  { %935 = vmatprep.subr.bf16.mxu0 %v1504_v32 }
  0x7b   :  { %936 = vmatpush1.bf16.msra.mxu0 %v1502_v33 }
  0x7c   :  { %937 = vmatprep.subr.bf16.mxu0 %v1510_v34 }
  0x7f   :  { %938 = vmatpush1.bf16.msra.mxu0 %v1508_v37 }
  0x82   :  { %940 = vmatmul.mubr.bf16.vlgmr.msra.gmra.mrb[0].mxu0 %v214_v38 }
 0x125   :  { %v855_v49 = vpop.f32.mrb[0].mxu1 }
 0x126   :  { %v857_v50 = vpop.f32.mrb[1].mxu1  ;;  %v856_v62 = vadd.f32 %v855_v49, %v320_v60 }
 0x127   :  { %v859_v51 = vpop.f32.mrb[2].mxu1  ;;  %v858_v63 = vadd.f32 %v857_v50, %v324_v61 }
 0x128   :  { %v861_v52 = vpop.f32.mrb[3].mxu1  ;;  %v860_v1 = vadd.f32 %v859_v51, %v320_v60 }
 0x129   :  { %v862_v4 = vadd.f32 %v861_v52, %v324_v61 }
 0x12d   :  { %v984_v53 = vpop.f32.mrb[4].mxu1 }
 0x12e   :  { %v986_v54 = vpop.f32.mrb[5].mxu1 }
 0x12f   :  { %v988_v55 = vpop.f32.mrb[6].mxu1 }
 0x130   :  { %v990_v56 = vpop.f32.mrb[7].mxu1 }
 0x155   :  { %v941_v0 = vpop.f32.mrb[0].mxu0 }
 0x156   :  { %v1332_v2 = vadd.f32 %v941_v0, %v856_v62  ;;  %v943_v3 = vpop.f32.mrb[1].mxu0 }
 0x157   :  { %v1335_v5 = vadd.f32 %v943_v3, %v858_v63  ;;  %v945_v6 = vpop.f32.mrb[2].mxu0 }
 0x158   :  { %v1333_v28 = vadd.f32 %v1332_v2, %v984_v53  ;;  %v1338_v7 = vadd.f32 %v945_v6, %v860_v1  ;;  %v947_v8 = vpop.f32.mrb[3].mxu0 }
 0x159   :  { %v1336_v9 = vadd.f32 %v1335_v5, %v986_v54  ;;  %v1341_v10 = vadd.f32 %v947_v8, %v862_v4 }
 0x15a   :  { %v1339_v11 = vadd.f32 %v1338_v7, %v988_v55  ;;  %v993_v13 = vmax.f32 %v1333_v28, 0.0 }
 0x15b   :  { %v1342_v12 = vadd.f32 %v1341_v10, %v990_v56  ;;  %v994_v14 = vmax.f32 %v1336_v9, 0.0 }
 0x15c   :  { %v995_v21 = vmax.f32 %v1339_v11, 0.0 }
 0x15d   :  { %v996_v15 = vmax.f32 %v1342_v12, 0.0 }
 0x15e   :  { %v997_v16 = vpack.c.bf16 %v995_v21, %v993_v13 }
 0x15f   :  { %v998_v17 = vpack.c.bf16 %v996_v15, %v994_v14 }
 0x161   :  { %1166 = vmatprep.mubr.bf16.mxu1 %v998_v17 }
 0x162   :  { %1167 = vmatmul.mubr.bf16.vlgmr.msra.gmra.mrb[8].mxu1 %v997_v16 }
 0x235   :  { %v1325_v18 = vpop.f32.mrb[8].mxu1 }
 0x236   :  { %v1326_v20 = vpop.f32.mrb[9].mxu1 }
 0x237   :  { %v1327_v22 = vadd.f32 %v1326_v20, %v1325_v18  ;;  %v1328_v23 = vpop.f32.mrb[10].mxu1 }
 0x238   :  { %v1329_v24 = vpop.f32.mrb[11].mxu1 }
 0x239   :  { %v1169_v25 = vadd.f32 %v1327_v22, %v1292_v19  ;;  %v1330_v26 = vadd.f32 %v1329_v24, %v1328_v23 }
 0x23b   :  { %1175 = vst [vmem:[#allocation2] sm:$0xff] %v1169_v25  ;;  %v1172_v27 = vadd.f32 %v1330_v26, %v1292_v19 }
 0x23d   :  { %1176 = vst [vmem:[#allocation2 + $0x8] sm:$0xff] %v1172_v27 }
 0x23e   :  { %1181 = vsyncadd [#allocation3], 224  ;;  %s1565_s26 = smov [#allocation2]  }
 0x23f   :  { %s1182_s0 = sshll.u32 %s1565_s26, 4  ;;  %s1183_s0 = int_to_ptr.vmem [resolvable:$true] %s1182_s0 }
 0x240   :  { %s1539_s27 = scalar_lea.vmem %s1183_s0, 32  ;;  %s1543_s28 = scalar_lea.vmem %s1183_s0, 256 }
 0x241   :  { %p1540_p0 = scmp.ne.s32.totalorder %s1183_s0, %s1539_s27  ;;  %p1544_p1 = scmp.lt.s32.totalorder %s1183_s0, %s1183_s0 }
 0x242   :  { %p1545_p2 = scmp.lt.s32.totalorder %s1543_s28, %s1539_s27 }
 0x244   :  { %p1546_p3 = por %p1545_p2, %p1544_p1 }
 0x246   :  { %p1547_p4 = pnand %p1546_p3, %p1540_p0 }
 0x248   :  { %1550 = shalt.err (!%p1547_p4)
}
 0x249   :  { %s1551_s30 = scalar_lea.hbm %s2066_s5, 32 }
 0x24a   :  { %p1552_p5 = scmp.ne.s32.totalorder %s2066_s5, %s1551_s30  ;;  %p1555_p6 = scmp.lt.u32.totalorder %s1551_s30, %s2066_s5 }
 0x24c   :  { %p1557_p7 = pnand %p1555_p6, %p1552_p5 }
 0x24e   :  { %1560 = shalt.err (!%p1557_p7)
}
 0x24f   :  { %s1566_s10 = smov 32   ;;  %s1567_s11 = smov 2  }
 0x250   :  { %1188 = dma.vmem_to_hbm [thread:$0]  %s1183_s0, 32, %s2066_s5, [#allocation3], %s1566_s10, %s1566_s10, %s1567_s11  }
 0x251   :  { %1561 = dma.done.wait [#allocation3], 256  }
 0x252   :  { %1562 = vsyncadd [#allocation3], 4294967040 }
 0x253   :  { %1192 = vsyncpa [#allocation3], 1 }

</bundles_post_ra>
